<compile_context>
chip_gen: v5e
topology: v5e:2x2
jax: 0.10.0
libtpu: 0.0.40
codegen_flags: <defaults>
</compile_context>

<pallas_src>
import functools
import math

import jax
import jax.numpy as jnp
from jax import lax
from jax.experimental import pallas as pl
from jax.experimental.pallas import tpu as pltpu


# ---------------------------------------------------------------------------
# Hardware-aware configuration & tiling helpers
# ---------------------------------------------------------------------------

@functools.lru_cache(maxsize=None)
def _hw_config():
    """Generation-specific GEMM tile caps and scoped-VMEM limit."""
    vmem_cap = 64 * 1024 * 1024
    try:
        get_info = getattr(pltpu, "get_tpu_info", None)
        if get_info is not None:
            info = get_info()
            vmem_cap = int(getattr(info, "vmem_capacity_bytes", vmem_cap))
    except Exception:
        pass
    if vmem_cap >= 100 * 1024 * 1024:
        # v5e / v6e: 128 MiB physical VMEM -> big tiles reach ~85% of HBM roofline
        return {"tm_cap": 512, "tn_cap": 512, "tk_cap": 1024,
                "vmem_limit": 96 * 1024 * 1024}
    # v7x: 64 MiB physical VMEM -> keep tiles and the limit conservative
    return {"tm_cap": 256, "tn_cap": 256, "tk_cap": 512,
            "vmem_limit": 48 * 1024 * 1024}


def _round_up(x, m):
    return (x + m - 1) // m * m


def _pick_tile(dim, cap, align):
    """Return (tile, padded_dim). Largest aligned tile <= cap dividing dim;
    if none exists, pad dim up to a multiple of the aligned cap instead of
    falling back to a (possibly VMEM-exceeding) full-extent block."""
    if dim <= cap:
        return dim, dim                       # full-extent block is always legal
    t = max((cap // align) * align, align)
    tt = t
    while tt >= align:
        if dim % tt == 0:
            return tt, dim
        tt -= align
    return t, _round_up(dim, t)


# ---------------------------------------------------------------------------
# Projection GEMM kernels
# ---------------------------------------------------------------------------

def _matmul_kernel(x_ref, w_ref, o_ref, acc_ref):
    # o = x @ w, accumulated over the K grid axis in an f32 VMEM scratch.
    @pl.when(pl.program_id(2) == 0)
    def _():
        acc_ref[...] = jnp.zeros_like(acc_ref)

    acc_ref[...] += jnp.dot(x_ref[...], w_ref[...],
                            preferred_element_type=jnp.float32)

    @pl.when(pl.program_id(2) == pl.num_programs(2) - 1)
    def _():
        o_ref[...] = acc_ref[...].astype(o_ref.dtype)


def _matmul_bias_kernel(x_ref, w_ref, b_ref, o_ref, acc_ref):
    # o = x @ w + b
    @pl.when(pl.program_id(2) == 0)
    def _():
        acc_ref[...] = jnp.zeros_like(acc_ref)

    acc_ref[...] += jnp.dot(x_ref[...], w_ref[...],
                            preferred_element_type=jnp.float32)

    @pl.when(pl.program_id(2) == pl.num_programs(2) - 1)
    def _():
        o_ref[...] = (acc_ref[...] + b_ref[...]).astype(o_ref.dtype)


def _matmul_kernel_1k(x_ref, w_ref, o_ref):
    # Single K step: no accumulator scratch, no init/finalize overhead.
    o_ref[...] = jnp.dot(x_ref[...], w_ref[...],
                         preferred_element_type=jnp.float32).astype(o_ref.dtype)


def _matmul_bias_kernel_1k(x_ref, w_ref, b_ref, o_ref):
    o_ref[...] = (jnp.dot(x_ref[...], w_ref[...],
                          preferred_element_type=jnp.float32)
                  + b_ref[...]).astype(o_ref.dtype)


def _pallas_matmul(x, w, b=None, out_dtype=None):
    """(M, K) @ (K, N) [+ (1, N)] -> (M, N), tiled + pipelined, f32 accumulation."""
    M, K = x.shape
    K2, N = w.shape
    assert K == K2
    out_dtype = x.dtype if out_dtype is None else out_dtype
    cfg = _hw_config()

    # bf16 packs 2 rows/sublane -> align tm to 16 to avoid packed-row relayouts
    align_m = 16 if x.dtype == jnp.bfloat16 else 8
    tm, Mp = _pick_tile(M, cfg["tm_cap"], align_m)
    tn, Np = _pick_tile(N, cfg["tn_cap"], 128)
    tk, Kp = _pick_tile(K, cfg["tk_cap"], 128)

    # Zero-pad awkward (non-divisible, > cap) dims; padding is numerically inert.
    if Mp != M or Kp != K:
        x = jnp.pad(x, ((0, Mp - M), (0, Kp - K)))
    if Kp != K or Np != N:
        w = jnp.pad(w, ((0, Kp - K), (0, Np - N)))
    if b is not None and Np != N:
        b = jnp.pad(b, ((0, 0), (0, Np - N)))

    grid_k = Kp // tk
    itemsize = jnp.dtype(x.dtype).itemsize
    cost = pl.CostEstimate(
        flops=2 * M * N * K, transcendentals=0,
        bytes_accessed=int((M * K + K * N + M * N
                            + (N if b is not None else 0)) * itemsize))

    if grid_k == 1:
        grid = (Mp // tm, Np // tn)
        in_specs = [pl.BlockSpec((tm, Kp), lambda i, j: (i, 0)),
                    pl.BlockSpec((Kp, tn), lambda i, j: (0, j))]
        if b is not None:
            in_specs.append(pl.BlockSpec((1, tn), lambda i, j: (0, j)))
        out = pl.pallas_call(
            _matmul_bias_kernel_1k if b is not None else _matmul_kernel_1k,
            out_shape=jax.ShapeDtypeStruct((Mp, Np), out_dtype),
            grid=grid, in_specs=in_specs,
            out_specs=pl.BlockSpec((tm, tn), lambda i, j: (i, j)),
            compiler_params=pltpu.CompilerParams(
                dimension_semantics=("parallel", "parallel"),
                vmem_limit_bytes=cfg["vmem_limit"]),
            cost_estimate=cost,
        )(*((x, w) if b is None else (x, w, b)))
    else:
        grid = (Mp // tm, Np // tn, grid_k)
        in_specs = [pl.BlockSpec((tm, tk), lambda i, j, k: (i, k)),
                    pl.BlockSpec((tk, tn), lambda i, j, k: (k, j))]
        if b is not None:
            in_specs.append(pl.BlockSpec((1, tn), lambda i, j, k: (0, j)))
        out = pl.pallas_call(
            _matmul_bias_kernel if b is not None else _matmul_kernel,
            out_shape=jax.ShapeDtypeStruct((Mp, Np), out_dtype),
            grid=grid, in_specs=in_specs,
            out_specs=pl.BlockSpec((tm, tn), lambda i, j, k: (i, j)),
            scratch_shapes=[pltpu.VMEM((tm, tn), jnp.float32)],
            compiler_params=pltpu.CompilerParams(
                dimension_semantics=("parallel", "parallel", "arbitrary"),
                vmem_limit_bytes=cfg["vmem_limit"]),
            cost_estimate=cost,
        )(*((x, w) if b is None else (x, w, b)))

    if Mp != M or Np != N:
        out = out[:M, :N]
    return out


# ---------------------------------------------------------------------------
# Attention kernels (one (batch, head) per grid step; head-major layout)
# ---------------------------------------------------------------------------

_QK_DIMNUMS = (((1,), (1,)), ((), ()))   # contract last dims, no batch dims


def _attn_dense_kernel(qkv_ref, o_ref, *, scale):
    """qkv_ref: (3, 1, 1, n, d) head-major block -> o_ref: (1, 1, n, d)."""
    q = qkv_ref[0, 0, 0] * scale                     # fold scale into q once
    k = qkv_ref[1, 0, 0]
    v = qkv_ref[2, 0, 0]
    s = lax.dot_general(q, k, _QK_DIMNUMS,
                        preferred_element_type=jnp.float32)          # (n, n)
    m = jnp.max(s, axis=-1, keepdims=True)
    p = jnp.exp(s - m)                                               # f32 softmax
    l = jnp.sum(p, axis=-1, keepdims=True)
    o = jnp.dot(p.astype(v.dtype), v, preferred_element_type=jnp.float32)
    o_ref[0, 0] = (o / l).astype(o_ref.dtype)        # normalize AFTER PV: n*d, not n^2


def _attn_dense_bias_kernel(qkv_ref, qkb_ref, o_ref, *, scale):
    """Bias path: dots = q.k^T ; dots += qb.kb^T (no q||qb / k||kb concats)."""
    q = qkv_ref[0, 0, 0] * scale
    k = qkv_ref[1, 0, 0]
    v = qkv_ref[2, 0, 0]
    qb = qkb_ref[0, 0, 0] * scale
    kb = qkb_ref[1, 0, 0]
    s = lax.dot_general(q, k, _QK_DIMNUMS, preferred_element_type=jnp.float32)
    s += lax.dot_general(qb, kb, _QK_DIMNUMS, preferred_element_type=jnp.float32)
    m = jnp.max(s, axis=-1, keepdims=True)
    p = jnp.exp(s - m)
    l = jnp.sum(p, axis=-1, keepdims=True)
    o = jnp.dot(p.astype(v.dtype), v, preferred_element_type=jnp.float32)
    o_ref[0, 0] = (o / l).astype(o_ref.dtype)


def _attn_flash_kernel(q_ref, k_ref, v_ref, o_ref, m_sc, l_sc, acc_sc, *, scale):
    """Flash-style online softmax; KV tiled along grid axis 2."""
    kv = pl.program_id(2)

    @pl.when(kv == 0)
    def _():
        m_sc[...] = jnp.full_like(m_sc, -jnp.inf)
        l_sc[...] = jnp.zeros_like(l_sc)
        acc_sc[...] = jnp.zeros_like(acc_sc)

    q = q_ref[0, 0, 0] * scale
    k = k_ref[0, 0, 0]
    v = v_ref[0, 0, 0]
    s = lax.dot_general(q, k, _QK_DIMNUMS,
                        preferred_element_type=jnp.float32)          # (n, tkv)
    m_new = jnp.maximum(m_sc[...], jnp.max(s, axis=-1, keepdims=True))
    alpha = jnp.exp(m_sc[...] - m_new)
    p = jnp.exp(s - m_new)
    l_sc[...] = alpha * l_sc[...] + jnp.sum(p, axis=-1, keepdims=True)
    acc_sc[...] = alpha * acc_sc[...] + jnp.dot(p.astype(v.dtype), v,
                                                preferred_element_type=jnp.float32)
    m_sc[...] = m_new

    @pl.when(kv == pl.num_programs(2) - 1)
    def _():
        o_ref[0, 0] = (acc_sc[...] / l_sc[...]).astype(o_ref.dtype)


def _attn_flash_bias_kernel(q_ref, k_ref, v_ref, qb_ref, kb_ref, o_ref,
                            m_sc, l_sc, acc_sc, *, scale):
    kv = pl.program_id(2)

    @pl.when(kv == 0)
    def _():
        m_sc[...] = jnp.full_like(m_sc, -jnp.inf)
        l_sc[...] = jnp.zeros_like(l_sc)
        acc_sc[...] = jnp.zeros_like(acc_sc)

    q = q_ref[0, 0, 0] * scale
    k = k_ref[0, 0, 0]
    v = v_ref[0, 0, 0]
    qb = qb_ref[0, 0, 0] * scale
    kb = kb_ref[0, 0, 0]
    s = lax.dot_general(q, k, _QK_DIMNUMS, preferred_element_type=jnp.float32)
    s += lax.dot_general(qb, kb, _QK_DIMNUMS, preferred_element_type=jnp.float32)
    m_new = jnp.maximum(m_sc[...], jnp.max(s, axis=-1, keepdims=True))
    alpha = jnp.exp(m_sc[...] - m_new)
    p = jnp.exp(s - m_new)
    l_sc[...] = alpha * l_sc[...] + jnp.sum(p, axis=-1, keepdims=True)
    acc_sc[...] = alpha * acc_sc[...] + jnp.dot(p.astype(v.dtype), v,
                                                preferred_element_type=jnp.float32)
    m_sc[...] = m_new

    @pl.when(kv == pl.num_programs(2) - 1)
    def _():
        o_ref[0, 0] = (acc_sc[...] / l_sc[...]).astype(o_ref.dtype)


def _pallas_attention(qkv5, qkb5, *, scale, out_dtype, attn_impl="auto",
                      kv_tile=None):
    """qkv5: (3, b, heads, n, d) [+ optional qkb5: (2, b, heads, n, d)]
    -> (b, heads, n, d). Grid (b, heads) dense, (b, heads, kv) flash."""
    _, b, heads, n, d = qkv5.shape
    cfg = _hw_config()
    itemsize = jnp.dtype(qkv5.dtype).itemsize

    # Flash when the dense (n, n) f32 scores would not fit the VMEM budget.
    dense_bytes = 8 * n * n + 2 * 2 * 4 * n * d * itemsize
    use_flash = (attn_impl == "flash") or (
        attn_impl == "auto" and dense_bytes > cfg["vmem_limit"] // 3)

    qk_flops = 2 * b * heads * n * n * d
    flops = 2 * qk_flops + (qk_flops if qkb5 is not None else 0)
    bytes_accessed = (qkv5.size + b * heads * n * d
                      + (qkb5.size if qkb5 is not None else 0)) * itemsize
    cost = pl.CostEstimate(flops=int(flops),
                           transcendentals=int(b * heads * n * n),
                           bytes_accessed=int(bytes_accessed))
    out_shape = jax.ShapeDtypeStruct((b, heads, n, d), out_dtype)
    out_spec_dense = pl.BlockSpec((1, 1, n, d), lambda bi, hi: (bi, hi, 0, 0))

    if not use_flash:
        in_specs = [pl.BlockSpec((3, 1, 1, n, d), lambda bi, hi: (0, bi, hi, 0, 0))]
        args = [qkv5]
        if qkb5 is None:
            kernel = functools.partial(_attn_dense_kernel, scale=scale)
        else:
            in_specs.append(
                pl.BlockSpec((2, 1, 1, n, d), lambda bi, hi: (0, bi, hi, 0, 0)))
            args.append(qkb5)
            kernel = functools.partial(_attn_dense_bias_kernel, scale=scale)
        return pl.pallas_call(
            kernel, out_shape=out_shape, grid=(b, heads),
            in_specs=in_specs, out_specs=out_spec_dense,
            compiler_params=pltpu.CompilerParams(
                dimension_semantics=("parallel", "parallel"),
                vmem_limit_bytes=cfg["vmem_limit"]),
            cost_estimate=cost,
        )(*args)

    # ---- flash path ----
    if kv_tile is None:
        # TODO(synk): pad/mask ragged n instead of falling back to a single KV step.
        kv_tile = next((t for t in (1024, 512, 256, 128, 64, 32, 16, 8)
                        if n % t == 0 and t < n), n)
    assert n % kv_tile == 0
    n_kv = n // kv_tile

    q_spec = pl.BlockSpec((1, 1, 1, n, d), lambda bi, hi, ki: (0, bi, hi, 0, 0))
    k_spec = pl.BlockSpec((1, 1, 1, kv_tile, d), lambda bi, hi, ki: (1, bi, hi, ki, 0))
    v_spec = pl.BlockSpec((1, 1, 1, kv_tile, d), lambda bi, hi, ki: (2, bi, hi, ki, 0))
    in_specs = [q_spec, k_spec, v_spec]
    args = [qkv5, qkv5, qkv5]          # same HBM buffer, three block views
    if qkb5 is None:
        kernel = functools.partial(_attn_flash_kernel, scale=scale)
    else:
        in_specs += [
            pl.BlockSpec((1, 1, 1, n, d), lambda bi, hi, ki: (0, bi, hi, 0, 0)),
            pl.BlockSpec((1, 1, 1, kv_tile, d), lambda bi, hi, ki: (1, bi, hi, ki, 0)),
        ]
        args += [qkb5, qkb5]
        kernel = functools.partial(_attn_flash_bias_kernel, scale=scale)

    return pl.pallas_call(
        kernel, out_shape=out_shape, grid=(b, heads, n_kv),
        in_specs=in_specs,
        out_specs=pl.BlockSpec((1, 1, n, d), lambda bi, hi, ki: (bi, hi, 0, 0)),
        scratch_shapes=[pltpu.VMEM((n, 1), jnp.float32),
                        pltpu.VMEM((n, 1), jnp.float32),
                        pltpu.VMEM((n, d), jnp.float32)],
        compiler_params=pltpu.CompilerParams(
            dimension_semantics=("parallel", "parallel", "arbitrary"),
            vmem_limit_bytes=cfg["vmem_limit"]),
        cost_estimate=cost,
    )(*args)


# ---------------------------------------------------------------------------
# TemporalAttention forward
# ---------------------------------------------------------------------------

def init_temporal_attention_params(key, dim, heads=8, dim_head=64,
                                   dtype=jnp.float32):
    """Deterministic parameter init mirroring the PyTorch module shapes."""
    inner_dim = dim_head * heads
    project_out = not (heads == 1 and dim_head == dim)
    k1, k2, k3 = jax.random.split(key, 3)
    bound_qkv = 1.0 / math.sqrt(dim)              # nn.Linear default init
    w_qkv = jax.random.uniform(k1, (dim, inner_dim * 3), dtype,
                               minval=-bound_qkv, maxval=bound_qkv)
    params = {"w_qkv": w_qkv, "project_out": project_out}
    if project_out:
        bound_out = 1.0 / math.sqrt(inner_dim)
        params["w_out"] = jax.random.uniform(k2, (inner_dim, dim), dtype,
                                             minval=-bound_out, maxval=bound_out)
        params["b_out"] = jax.random.uniform(k3, (1, dim), dtype,
                                             minval=-bound_out, maxval=bound_out)
    return params


def temporal_attention_forward(params, x, bias=None, *, heads, dim_head,
                               compute_dtype=None, attn_impl="auto",
                               kv_tile=None):
    """x: (b, n, dim); optional bias: (b, n, dim). Returns (b, n, dim).

    compute_dtype: dtype fed to the MXU matmuls (jnp.bfloat16 recommended on
    v5e/v6e/v7x); accumulation and the softmax stay in f32. Default: x.dtype."""
    b, n, dim = x.shape
    inner = heads * dim_head
    scale = dim_head ** (-0.5)
    out_dtype = x.dtype
    cdt = out_dtype if compute_dtype is None else compute_dtype

    w_qkv = params["w_qkv"].astype(cdt)

    # QKV projection (tiled Pallas GEMM)
    qkv = _pallas_matmul(x.astype(cdt).reshape(b * n, dim), w_qkv, out_dtype=cdt)
    # Head-major layout (3, b, heads, n, d): per-head q/k/v become leading-axis
    # indices of a BlockSpec block -> no lane-offset slicing inside the kernel.
    qkv5 = jnp.transpose(qkv.reshape(b, n, 3, heads, dim_head), (2, 0, 3, 1, 4))

    qkb5 = None
    if bias is not None:
        # only the q,k thirds of the bias projection are used -> skip V's GEMM
        w_qk = w_qkv[:, :2 * inner]
        qkb = _pallas_matmul(bias.astype(cdt).reshape(b * n, dim), w_qk,
                             out_dtype=cdt)
        qkb5 = jnp.transpose(qkb.reshape(b, n, 2, heads, dim_head), (2, 0, 3, 1, 4))

    out = _pallas_attention(qkv5, qkb5, scale=scale, out_dtype=cdt,
                            attn_impl=attn_impl, kv_tile=kv_tile)  # (b, h, n, d)
    out = jnp.transpose(out, (0, 2, 1, 3)).reshape(b * n, inner)   # (b*n, h*d)

    # output projection (Dropout is identity at eval time)
    if params["project_out"]:
        out = _pallas_matmul(out, params["w_out"].astype(cdt),
                             params["b_out"].astype(cdt), out_dtype=out_dtype)
        return out.reshape(b, n, dim)
    return out.reshape(b, n, inner).astype(out_dtype)


# ---------------------------------------------------------------------------
# Reference (plain JAX, f32) for sanity checks
# ---------------------------------------------------------------------------

def _reference_forward(params, x, bias=None, *, heads, dim_head):
    b, n, dim = x.shape
    inner = heads * dim_head
    scale = dim_head ** (-0.5)

    def split_heads(t):
        return t.reshape(b, n, heads, dim_head).transpose(0, 2, 1, 3)

    qkv = x.reshape(b * n, dim) @ params["w_qkv"]
    qkv = qkv.reshape(b, n, 3 * inner)
    q = split_heads(qkv[..., :inner])
    k = split_heads(qkv[..., inner:2 * inner])
    v = split_heads(qkv[..., 2 * inner:])
    dots = jnp.einsum("bhid,bhjd->bhij", q, k) * scale
    if bias is not None:
        qkv_b = (bias.reshape(b * n, dim) @ params["w_qkv"]).reshape(b, n, 3 * inner)
        qb = split_heads(qkv_b[..., :inner])
        kb = split_heads(qkv_b[..., inner:2 * inner])
        dots = dots + jnp.einsum("bhid,bhjd->bhij", qb, kb) * scale
    attn = jax.nn.softmax(dots, axis=-1)
    out = jnp.einsum("bhij,bhjd->bhid", attn, v)
    out = out.transpose(0, 2, 1, 3).reshape(b * n, inner)
    if params["project_out"]:
        out = out @ params["w_out"] + params["b_out"]
        return out.reshape(b, n, dim)
    return out.reshape(b, n, inner)


# ---------------------------------------------------------------------------
if __name__ == "__main__":
    batch, seq, dim = 2, 8, 32
    heads, dim_head = 4, 16

    key = jax.random.PRNGKey(0)
    k_param, k_x, k_bias, k_xf, k_bf = jax.random.split(key, 5)

    params = init_temporal_attention_params(k_param, dim, heads=heads,
                                            dim_head=dim_head)
    x = jax.random.normal(k_x, (batch, seq, dim), jnp.float32)
    bias_in = jax.random.normal(k_bias, (batch, seq, dim), jnp.float32)

    # --- f32 dense path, no bias ---
    out = temporal_attention_forward(params, x, heads=heads, dim_head=dim_head)
    out = jax.block_until_ready(out)
    ref = _reference_forward(params, x, heads=heads, dim_head=dim_head)
    assert out.shape == (batch, seq, dim)
    tol = 1e-2 * (1.0 + float(jnp.max(jnp.abs(ref))))
    assert float(jnp.max(jnp.abs(out - ref))) < tol

    # --- f32 dense path, bias ---
    out_b = temporal_attention_forward(params, x, bias_in,
                                       heads=heads, dim_head=dim_head)
    out_b = jax.block_until_ready(out_b)
    ref_b = _reference_forward(params, x, bias_in, heads=heads, dim_head=dim_head)
    tol_b = 1e-2 * (1.0 + float(jnp.max(jnp.abs(ref_b))))
    assert float(jnp.max(jnp.abs(out_b - ref_b))) < tol_b

    # --- bf16 MXU operands / f32 accumulation ---
    out_bf = temporal_attention_forward(params, x, bias_in,
                                        heads=heads, dim_head=dim_head,
                                        compute_dtype=jnp.bfloat16)
    out_bf = jax.block_until_ready(out_bf)
    tol_bf = 5e-2 * (1.0 + float(jnp.max(jnp.abs(ref_b))))
    assert float(jnp.max(jnp.abs(out_bf.astype(jnp.float32) - ref_b))) < tol_bf

    # --- flash (tiled-KV online-softmax) path, forced, multi-step KV ---
    seq_f = 128
    x_f = jax.random.normal(k_xf, (batch, seq_f, dim), jnp.float32)
    bias_f = jax.random.normal(k_bf, (batch, seq_f, dim), jnp.float32)
    out_f = temporal_attention_forward(params, x_f, bias_f,
                                       heads=heads, dim_head=dim_head,
                                       attn_impl="flash", kv_tile=64)
    out_f = jax.block_until_ready(out_f)
    ref_f = _reference_forward(params, x_f, bias_f, heads=heads, dim_head=dim_head)
    tol_f = 1e-2 * (1.0 + float(jnp.max(jnp.abs(ref_f))))
    assert float(jnp.max(jnp.abs(out_f - ref_f))) < tol_f

    print("KERNEL_OK")
</pallas_src>

<mosaic_0001>
module attributes {stable_mosaic.version = 11 : i64} {
  func.func @_matmul_kernel_1k(%arg0: i32, %arg1: i32, %arg2: memref<16x32xf32, #tpu.memory_space<vmem>>, %arg3: memref<32x192xf32, #tpu.memory_space<vmem>>, %arg4: memref<16x192xf32, #tpu.memory_space<vmem>>) attributes {dimension_semantics = [#tpu.dimension_semantics<parallel>, #tpu.dimension_semantics<parallel>], iteration_bounds = array<i64: 1, 1>, scalar_prefetch = 0 : i64, scratch_operands = 0 : i64, tpu.core_type = #tpu.core_type<tc>, window_params = [{transform_indices = @transform_0, window_bounds = array<i64: 16, 32>}, {transform_indices = @transform_1, window_bounds = array<i64: 32, 192>}, {transform_indices = @transform_2, window_bounds = array<i64: 16, 192>}]} {
    %c0 = arith.constant 0 : index
    %c0_0 = arith.constant 0 : index
    %0 = vector.load %arg2[%c0, %c0_0] : memref<16x32xf32, #tpu.memory_space<vmem>>, vector<16x32xf32>
    %c0_1 = arith.constant 0 : index
    %c0_2 = arith.constant 0 : index
    %1 = vector.load %arg3[%c0_1, %c0_2] : memref<32x192xf32, #tpu.memory_space<vmem>>, vector<32x192xf32>
    %cst = arith.constant dense<0.000000e+00> : vector<16x192xf32>
    %2 = tpu.matmul %0, %1, %cst {dimension_numbers = #tpu.dot_dimension_numbers<[1], [0], [0], [1], [0, 0, 1, 1], [], []>} : vector<16x32xf32>, vector<32x192xf32>, vector<16x192xf32> -> vector<16x192xf32>
    %c0_3 = arith.constant 0 : index
    %c0_4 = arith.constant 0 : index
    %3 = vector.load %arg4[%c0_3, %c0_4] : memref<16x192xf32, #tpu.memory_space<vmem>>, vector<16x192xf32>
    tpu.vector_store %arg4[%c0_3, %c0_4], %2 {strides = array<i32>} : memref<16x192xf32, #tpu.memory_space<vmem>>, vector<16x192xf32>,
    return
  }
  func.func @transform_0(%arg0: i32, %arg1: i32) -> (i32, i32) {
    %c0_i32 = arith.constant 0 : i32
    %c0_i32_0 = arith.constant 0 : i32
    return %arg0, %c0_i32 : i32, i32
  }
  func.func @transform_1(%arg0: i32, %arg1: i32) -> (i32, i32) {
    %c0_i32 = arith.constant 0 : i32
    %c0_i32_0 = arith.constant 0 : i32
    return %c0_i32, %arg1 : i32, i32
  }
  func.func @transform_2(%arg0: i32, %arg1: i32) -> (i32, i32) {
    %c0_i32 = arith.constant 0 : i32
    return %arg0, %arg1 : i32, i32
  }
}

</mosaic_0001>

<bundles_post_ra>
// kernel: tpu_custom_call.1
= control target key start
LH: loop header
LB: loop body
LE: loop exit
PB: predicated region body
PF: predicated region fallthrough
CT: control target
= control target key end

     0   :  { %7 = vsyncpa [#allocation3], 0  ;;  %s266_s0 = inlined_call_operand.hbm [shape: f32[16,32], index: 0, kind: input, shape index: {}]   ;;  %s267_s1 = inlined_call_operand.hbm [shape: f32[32,192], index: 1, kind: input, shape index: {}]   ;;  %s268_s2 = inlined_call_operand.hbm [shape: f32[16,192], index: 2, kind: output, shape index: {}]  }
   0x1   :  { %8 = vsyncpa [#allocation6], 0 }
   0x2   :  { %9 = vsyncpa [#allocation4], 0  ;;  %s14_s11 = sshll.u32 %s266_s0, 4  ;;  %s229_s12 = smov [#allocation2]   ;;  %s15_s11 = int_to_ptr.hbm [resolvable:$true] %s14_s11 }
   0x3   :  { %s16_s13 = sshll.u32 %s229_s12, 4  ;;  %s27_s16 = sshll.u32 %s267_s1, 4  ;;  %s17_s13 = int_to_ptr.vmem [resolvable:$true] %s16_s13  ;;  %s28_s16 = int_to_ptr.hbm [resolvable:$true] %s27_s16 }
   0x4   :  { %s230_s17 = smov 128   ;;  %s231_s18 = smov 8  }
   0x5   :  { %22 = dma.hbm_to_vmem [thread:$0]  %s15_s11, 256, %s17_s13, [#allocation3], %s230_s17, %s230_s17, %s231_s18  }
   0x6   :  { %s232_s19 = smov [#allocation5]   ;;  %s233_s21 = smov 256  }
   0x7   :  { %s29_s20 = sshll.u32 %s232_s19, 4  ;;  %s234_s22 = smov 16   ;;  %s30_s20 = int_to_ptr.vmem [resolvable:$true] %s29_s20 }
   0x8   :  { %35 = dma.hbm_to_vmem [thread:$0]  %s28_s16, 1024, %s30_s20, [#allocation6], %s233_s21, %s233_s21, %s234_s22  }
   0x9   :  { %223 = dma.done.wait [#allocation3], 256  }
   0xa   :  { %224 = vsyncadd [#allocation3], 4294967040 }
   0xb   :  { %225 = dma.done.wait [#allocation6], 1024  }
   0xc   :  { %226 = vsyncadd [#allocation6], 4294966272  ;;  %v52_v0 = vld [vmem:[#allocation5 + $0x30] sm:$0xff]  ;;  %v53_v1 = vld [vmem:[#allocation5 + $0x38] sm:$0xff]  ;;  %vm54_vm0 = vcmask 261120   ;;  %vm108_vm1 = vcmask 523264  }
   0xd   :  { %v50_v2 = vld [vmem:[#allocation5 + $0x20] sm:$0xff]  ;;  %136 = vmatpush.msra.mxu2 %v52_v0  ;;  %140 = vmatpush.msra.mxu3 %v53_v1  ;;  %v51_v3 = vld [vmem:[#allocation5 + $0x28] sm:$0xff]  ;;  %v48_v4 = vld [vmem:[#allocation5 + $0x10] sm:$0xff]  ;;  %s235_s0 = smov [#allocation7]   ;;  %s118_s25 = sshll.u32 %s268_s2, 4  ;;  %s119_s25 = int_to_ptr.hbm [resolvable:$true] %s118_s25 }
   0xe   :  { %v49_v5 = vld [vmem:[#allocation5 + $0x18] sm:$0xff]  ;;  %73 = vmatpush.msra.mxu0 %v52_v0  ;;  %96 = vmatpush.msra.mxu1 %v53_v1  ;;  %v46_v6 = vld [vmem:[#allocation5] sm:$0xff]  ;;  %v47_v7 = vld [vmem:[#allocation5 + $0x8] sm:$0xff]  ;;  %s116_s1 = sshll.u32 %s235_s0, 4  ;;  %s117_s1 = int_to_ptr.vmem [resolvable:$true] %s116_s1 }
   0xf   :  { %137 = vmatpush.msra.mxu2 %v50_v2  ;;  %141 = vmatpush.msra.mxu3 %v51_v3  ;;  %v45_v8 = vld [vmem:[#allocation2 + $0x8] sm:$0xff]  ;;  %v44_v9 = vld [vmem:[#allocation2] sm:$0xff] }
  0x10   :  { %74 = vmatpush.msra.mxu0 %v50_v2  ;;  %97 = vmatpush.msra.mxu1 %v51_v3 }
  0x11   :  { %138 = vmatpush.msra.mxu2 %v48_v4  ;;  %142 = vmatpush.msra.mxu3 %v49_v5 }
  0x12   :  { %75 = vmatpush.msra.mxu0 %v48_v4  ;;  %98 = vmatpush.msra.mxu1 %v49_v5 }
  0x13   :  { %139 = vmatpush.msra.mxu2 %v46_v6  ;;  %143 = vmatpush.msra.mxu3 %v47_v7 }
  0x14   :  { %133 = vmatmul.msk.f32.vlgmr.msra.gmra.mxu2 %vm54_vm0, %v45_v8  ;;  %135 = vmatmul.msk.f32.vlgmr.msra.gmra.mxu3 %vm54_vm0, %v45_v8 }
  0x15   :  { %76 = vmatpush.msra.mxu0 %v46_v6  ;;  %99 = vmatpush.msra.mxu1 %v47_v7 }
  0x16   :  { %132 = vmatmul.msk.f32.vlgmr.msra.gmra.mxu0 %vm54_vm0, %v44_v9  ;;  %134 = vmatmul.msk.f32.vlgmr.msra.gmra.mxu1 %vm54_vm0, %v44_v9 }
  0x93   :  { %v78_v10 = vpop.f32.mrf.mxu0  ;;  %v101_v11 = vpop.f32.mrf.mxu1 }
  0x94   :  { %107 = vst [vmem:[#allocation7] sm:$0xff] %v78_v10 }
  0x95   :  { %109 = vst.msk [vmem:[#allocation7 + $0x8] sm:$0xff] %vm108_vm1, %v101_v11 }
  0x97   :  { %v81_v12 = vpop.f32.mrf.mxu2  ;;  %v104_v13 = vpop.f32.mrf.mxu3 }
  0x98   :  { %110 = vst [vmem:[#allocation7 + $0x10] sm:$0xff] %v81_v12 }
  0x99   :  { %111 = vst.msk [vmem:[#allocation7 + $0x18] sm:$0xff] %vm108_vm1, %v104_v13 }
  0x9a   :  { %124 = dma.vmem_to_hbm [thread:$0]  %s117_s1, 512, %s119_s25, [#allocation4], %s233_s21, %s233_s21, %s234_s22  }
  0x9b   :  { %227 = dma.done.wait [#allocation4], 512  }
  0x9c   :  { %228 = vsyncadd [#allocation4], 4294966784 }
  0x9d   :  { %129 = vsyncpa [#allocation3], 1 }
  0x9e   :  { %130 = vsyncpa [#allocation6], 1 }
  0x9f   :  { %131 = vsyncpa [#allocation4], 1 }

</bundles_post_ra>
